<compile_context>
chip_gen: v5e
topology: v5e:2x2
jax: 0.10.0
libtpu: 0.0.40
codegen_flags: <defaults>
</compile_context>

<pallas_src>
import math

import jax
import jax.numpy as jnp
from jax.experimental import pallas as pl
from jax.experimental.pallas import tpu as pltpu


# ----------------------------------------------------------------------------
# helpers
# ----------------------------------------------------------------------------
def _round_up(x, m):
    return (x + m - 1) // m * m


def _gelu_exact(x):
    # nn.GELU() default = exact erf-based GELU
    return 0.5 * x * (1.0 + jax.lax.erf(x / jnp.sqrt(2.0).astype(x.dtype)))


def _pick_tile(dim, cap, align):
    """Pick (tile, padded_dim).  If dim fits the cap, the tile is the full dim
    (no padding, no post-slice, bypasses the (8,128) divisibility rule)."""
    if dim <= cap:
        return dim, dim
    t = max((cap // align) * align, align)
    return t, _round_up(dim, t)


# ----------------------------------------------------------------------------
# Pallas kernel 1: tiled matmul, bf16 operands, f32 accumulation, fused
#                  bias + activation + optional residual add in the epilogue
# ----------------------------------------------------------------------------
def _make_matmul_kernel(act, has_res):
    def kernel(*refs):
        if has_res:
            x_ref, w_ref, b_ref, r_ref, o_ref, acc_ref = refs
        else:
            x_ref, w_ref, b_ref, o_ref, acc_ref = refs
            r_ref = None

        @pl.when(pl.program_id(2) == 0)
        def _():
            acc_ref[...] = jnp.zeros_like(acc_ref)

        acc_ref[...] += jnp.dot(
            x_ref[...], w_ref[...], preferred_element_type=jnp.float32
        )

        @pl.when(pl.program_id(2) == pl.num_programs(2) - 1)
        def _():
            y = acc_ref[...] + b_ref[...]
            if has_res:
                y = y + r_ref[...]
            if act == "relu":
                y = jnp.maximum(y, 0.0)
            elif act == "gelu":
                y = _gelu_exact(y)
            o_ref[...] = y.astype(o_ref.dtype)

    return kernel


def matmul_bias_act(x, w, b, act="none", residual=None,
                    tm_cap=256, tn_cap=256, tk_cap=2304):
    """(M,K) @ (K,N) + b [+ residual] with fused activation.

    Operands are cast to bf16 (MXU-native); accumulation, bias, residual and
    activation stay in f32.  Tiles adapt to the problem shape so the tiny
    deep-layer matmuls are not padded to 128^3.
    """
    M, K = x.shape
    K2, N = w.shape
    assert K == K2

    x = x.astype(jnp.bfloat16)
    w = w.astype(jnp.bfloat16)
    b = b.astype(jnp.float32).reshape(1, N)

    tm, Mp = _pick_tile(M, tm_cap, 8)
    # If M collapses to a single tile, split N so >=2 parallel grid tiles exist
    # (keeps both TensorCores busy on v7x; also keeps weight blocks small).
    if Mp // tm == 1 and N >= 256:
        tn_cap = min(tn_cap, 128)
    tn, Np = _pick_tile(N, tn_cap, 128)
    tk, Kp = _pick_tile(K, tk_cap, 128)

    if Mp != M or Kp != K:
        x = jnp.pad(x, ((0, Mp - M), (0, Kp - K)))
    if Kp != K or Np != N:
        w = jnp.pad(w, ((0, Kp - K), (0, Np - N)))
    if Np != N:
        b = jnp.pad(b, ((0, 0), (0, Np - N)))

    has_res = residual is not None
    inputs = [x, w, b]
    in_specs = [
        pl.BlockSpec((tm, tk), lambda i, j, k: (i, k)),
        pl.BlockSpec((tk, tn), lambda i, j, k: (k, j)),
        pl.BlockSpec((1, tn), lambda i, j, k: (0, j)),
    ]
    if has_res:
        r = residual.astype(jnp.float32)
        if Mp != M or Np != N:
            r = jnp.pad(r, ((0, Mp - M), (0, Np - N)))
        inputs.append(r)
        in_specs.append(pl.BlockSpec((tm, tn), lambda i, j, k: (i, j)))

    out = pl.pallas_call(
        _make_matmul_kernel(act, has_res),
        out_shape=jax.ShapeDtypeStruct((Mp, Np), jnp.float32),
        grid_spec=pltpu.PrefetchScalarGridSpec(
            num_scalar_prefetch=0,
            grid=(Mp // tm, Np // tn, Kp // tk),
            in_specs=in_specs,
            out_specs=pl.BlockSpec((tm, tn), lambda i, j, k: (i, j)),
            scratch_shapes=[pltpu.VMEM((tm, tn), jnp.float32)],
        ),
        compiler_params=pltpu.CompilerParams(
            dimension_semantics=("parallel", "parallel", "arbitrary")
        ),
    )(*inputs)

    if Mp != M or Np != N:
        out = out[:M, :N]
    return out


# ----------------------------------------------------------------------------
# Pallas kernel 2: max-pool 3x3 / stride 2 / pad 1
#   9 taps are stacked on a LEADING block axis -> the reduce is a 9-way VPU
#   maximum (no sublane/XLU reduction); C stays on the lane axis.
# ----------------------------------------------------------------------------
def _maxpool_kernel(x_ref, o_ref):
    o_ref[...] = jnp.max(x_ref[...], axis=0)


def maxpool2d_3x3_s2_p1(x, tm_cap=512):
    N, H, W, C = x.shape
    xp = jnp.pad(x, ((0, 0), (1, 1), (1, 1), (0, 0)), constant_values=-jnp.inf)
    OH = (H + 2 - 3) // 2 + 1
    OW = (W + 2 - 3) // 2 + 1
    taps = [
        xp[:, kh: kh + OH * 2: 2, kw: kw + OW * 2: 2, :]
        for kh in range(3)
        for kw in range(3)
    ]
    p = jnp.stack(taps, axis=0).reshape(9, N * OH * OW, C)
    M = N * OH * OW
    tm, Mp = _pick_tile(M, tm_cap, 8)
    if Mp != M:
        p = jnp.pad(p, ((0, 0), (0, Mp - M), (0, 0)), constant_values=-jnp.inf)

    out = pl.pallas_call(
        _maxpool_kernel,
        out_shape=jax.ShapeDtypeStruct((Mp, C), jnp.float32),
        grid_spec=pltpu.PrefetchScalarGridSpec(
            num_scalar_prefetch=0,
            grid=(Mp // tm,),
            in_specs=[pl.BlockSpec((9, tm, C), lambda i: (0, i, 0))],
            out_specs=pl.BlockSpec((tm, C), lambda i: (i, 0)),
        ),
        compiler_params=pltpu.CompilerParams(
            dimension_semantics=("parallel",)
        ),
    )(p)
    if Mp != M:
        out = out[:M]
    return out.reshape(N, OH, OW, C)


# ----------------------------------------------------------------------------
# convolutions built on top of the Pallas matmul kernel
# ----------------------------------------------------------------------------
def conv2d(x, w, b, stride=1, padding=0, act="none", residual=None):
    """x: NHWC, w: (KH, KW, Cin, Cout).  Optional `residual` (NHWC, shape of the
    conv output) is added in the matmul epilogue before the activation."""
    N, H, W, C = x.shape
    KH, KW, Cin, Cout = w.shape
    assert C == Cin
    x = x.astype(jnp.bfloat16)                       # im2col built in bf16
    if padding:
        x = jnp.pad(x, ((0, 0), (padding, padding), (padding, padding), (0, 0)))
    Hp, Wp = H + 2 * padding, W + 2 * padding
    OH = (Hp - KH) // stride + 1
    OW = (Wp - KW) // stride + 1

    if KH == 1 and KW == 1 and stride == 1:
        pat = x.reshape(N * OH * OW, Cin)
    else:
        cols = [
            x[:, kh: kh + OH * stride: stride, kw: kw + OW * stride: stride, :]
            for kh in range(KH)
            for kw in range(KW)
        ]
        pat = jnp.concatenate(cols, axis=-1).reshape(N * OH * OW, KH * KW * Cin)

    res2 = None if residual is None else residual.reshape(N * OH * OW, Cout)
    out = matmul_bias_act(pat, w.reshape(KH * KW * Cin, Cout), b,
                          act=act, residual=res2)
    return out.reshape(N, OH, OW, Cout)


def conv_transpose2d_k3_s2_p1_op1(x, w, b, act="none"):
    """nn.ConvTranspose2d(Cin, Cout, 3, stride=2, padding=1, output_padding=1).

    Packed sub-pixel formulation: the 4 output parities (2x2) become 4 blocks
    of output columns of a single matmul; kernel taps that would multiply the
    zeros inserted by the transposed stride are dropped (weight rows left 0).
    `w` is stored in the equivalent-direct-conv layout (KH, KW, Cin, Cout)
    (weights are synthetic; the PyTorch layout differs by a spatial flip).
    """
    N, H, W, C = x.shape
    Cout = w.shape[-1]
    xe = jnp.pad(x, ((0, 0), (0, 1), (0, 1), (0, 0)))
    x00 = xe[:, :H, :W, :]     # x[m,   n  ]
    x01 = xe[:, :H, 1:, :]     # x[m,   n+1]
    x10 = xe[:, 1:, :W, :]     # x[m+1, n  ]
    x11 = xe[:, 1:, 1:, :]     # x[m+1, n+1]
    pat = jnp.concatenate([x00, x01, x10, x11], axis=-1).reshape(N * H * W, 4 * C)

    # out[2m+a, 2n+b] uses only the taps below (parity p = 2a + b):
    wb = jnp.zeros((4, C, 4, Cout), w.dtype)
    wb = wb.at[0, :, 0, :].set(w[1, 1])                                   # (0,0)
    wb = wb.at[0, :, 1, :].set(w[1, 0])
    wb = wb.at[1, :, 1, :].set(w[1, 2])                                   # (0,1)
    wb = wb.at[0, :, 2, :].set(w[0, 1])
    wb = wb.at[2, :, 2, :].set(w[2, 1])                                   # (1,0)
    wb = wb.at[0, :, 3, :].set(w[0, 0])
    wb = wb.at[1, :, 3, :].set(w[0, 2])
    wb = wb.at[2, :, 3, :].set(w[2, 0])
    wb = wb.at[3, :, 3, :].set(w[2, 2])                                   # (1,1)
    wb = wb.reshape(4 * C, 4 * Cout)
    bb = jnp.tile(b, 4)

    out = matmul_bias_act(pat, wb, bb, act=act)            # (N*H*W, 4*Cout)
    out = out.reshape(N, H, W, 2, 2, Cout)                 # (..., a, b, Cout)
    out = out.transpose(0, 1, 3, 2, 4, 5).reshape(N, 2 * H, 2 * W, Cout)
    return out


# ----------------------------------------------------------------------------
# deterministic parameter init (synthetic; shapes follow the module __init__)
# ----------------------------------------------------------------------------
class _KeyGen:
    def __init__(self, key):
        self.key = key

    def __call__(self):
        self.key, k = jax.random.split(self.key)
        return k


def _init_conv_bn(kg, kh, kw, cin, cout):
    # conv (no bias) + eval-mode BatchNorm folded into per-channel scale/shift
    w = jax.random.normal(kg(), (kh, kw, cin, cout), jnp.float32) / math.sqrt(kh * kw * cin)
    scale = 1.0 + 0.05 * jax.random.normal(kg(), (cout,), jnp.float32)
    shift = 0.05 * jax.random.normal(kg(), (cout,), jnp.float32)
    return w * scale, shift


def _init_conv_bias(kg, kh, kw, cin, cout):
    w = jax.random.normal(kg(), (kh, kw, cin, cout), jnp.float32) / math.sqrt(kh * kw * cin)
    b = 0.05 * jax.random.normal(kg(), (cout,), jnp.float32)
    return w, b


def init_params(key, feature_dim=256, neck_channels=256, feature_shape=(4, 4)):
    kg = _KeyGen(key)
    p = {}
    # ResNet-18 backbone (timm features_only): channels = [64, 64, 128, 256, 512]
    p["stem"] = _init_conv_bn(kg, 7, 7, 3, 64)
    blocks = []
    for (cin, cout, stride) in [(64, 64, 1), (64, 128, 2), (128, 256, 2), (256, 512, 2)]:
        for bi in range(2):
            s = stride if bi == 0 else 1
            ci = cin if bi == 0 else cout
            blk = {
                "conv1": _init_conv_bn(kg, 3, 3, ci, cout),
                "conv2": _init_conv_bn(kg, 3, 3, cout, cout),
                "stride": s,
            }
            if s != 1 or ci != cout:
                blk["down"] = _init_conv_bn(kg, 1, 1, ci, cout)
            blocks.append(blk)
    p["blocks"] = blocks
    nc = neck_channels
    p["up1"] = [
        _init_conv_bias(kg, 3, 3, 512, nc),  # Conv2d(channels[-1], nc, 3, pad=1)
        _init_conv_bias(kg, 3, 3, nc, nc),   # Conv2d(nc, nc, 3, pad=1)
        _init_conv_bias(kg, 3, 3, nc, nc),   # Conv2d(nc, nc, 3, pad=1)
        _init_conv_bias(kg, 3, 3, nc, nc),   # ConvTranspose2d(nc, nc, 3, 2, 1, 1)
    ]
    p["proj"] = [
        _init_conv_bias(kg, 3, 3, nc, nc),           # Conv2d(nc, nc, 3, pad=1)
        _init_conv_bias(kg, 1, 1, nc, feature_dim),  # Conv2d(nc, feature_dim, 1)
    ]
    # pos_embedding = 1e-5 * randn(1, feature_dim, *feature_shape)   (NCHW)
    p["pos"] = 1e-5 * jax.random.normal(
        kg(), (1, feature_dim) + tuple(feature_shape), jnp.float32
    )
    return p


# ----------------------------------------------------------------------------
# forward pass
# ----------------------------------------------------------------------------
def _basic_block(x, blk):
    w1, b1 = blk["conv1"]
    w2, b2 = blk["conv2"]
    s = blk["stride"]
    out = conv2d(x, w1, b1, stride=s, padding=1, act="relu")
    if "down" in blk:
        wd, bd = blk["down"]
        identity = conv2d(x, wd, bd, stride=s, padding=0, act="none")
    else:
        identity = x
    # residual add + ReLU fused into conv2's matmul epilogue
    return conv2d(out, w2, b2, stride=1, padding=1, act="relu", residual=identity)


def _resnet18_last_feature(x, p):
    w, b = p["stem"]
    x = conv2d(x, w, b, stride=2, padding=3, act="relu")
    x = maxpool2d_3x3_s2_p1(x)
    for blk in p["blocks"]:
        x = _basic_block(x, blk)
    return x  # (N, H/32, W/32, 512)


def timm_image_encoder_forward(x_nchw, p):
    """x_nchw: (N, 3, H, W) float32.  Returns (N, feature_dim, H/16, W/16) (NCHW)."""
    x = jnp.transpose(x_nchw, (0, 2, 3, 1)).astype(jnp.float32)  # -> NHWC
    f = _resnet18_last_feature(x, p)

    # up_1
    (w1, b1), (w2, b2), (w3, b3), (wt, bt) = p["up1"]
    y = conv2d(f, w1, b1, stride=1, padding=1, act="gelu")
    y = conv2d(y, w2, b2, stride=1, padding=1, act="gelu")
    y = conv2d(y, w3, b3, stride=1, padding=1, act="gelu")
    y = conv_transpose2d_k3_s2_p1_op1(y, wt, bt, act="gelu")

    # proj; pos-embedding add is fused into the final 1x1 conv's epilogue
    (wp1, bp1), (wp2, bp2) = p["proj"]
    y = conv2d(y, wp1, bp1, stride=1, padding=1, act="gelu")
    pos = jnp.transpose(p["pos"], (0, 2, 3, 1))                  # (1, fh, fw, fd)
    pos_b = jnp.broadcast_to(pos, (y.shape[0],) + pos.shape[1:])
    y = conv2d(y, wp2, bp2, stride=1, padding=0, act="none", residual=pos_b)

    return jnp.transpose(y, (0, 3, 1, 2))  # back to NCHW


# ----------------------------------------------------------------------------
if __name__ == "__main__":
    key = jax.random.PRNGKey(0)
    kp, kx = jax.random.split(key)

    # Small shapes consistent with the module: input 2x3x64x64 (NCHW),
    # backbone stride 32 -> 2x2 feature map, up_1 upsamples x2 -> feature_shape (4, 4).
    feature_dim = 256
    neck_channels = 256
    H = W = 64
    feature_shape = (H // 16, W // 16)  # (4, 4)

    params = init_params(kp, feature_dim, neck_channels, feature_shape)
    x = jax.random.normal(kx, (2, 3, H, W), jnp.float32)

    out = timm_image_encoder_forward(x, params)
    out = jax.block_until_ready(out)

    assert out.shape == (2, feature_dim) + feature_shape, out.shape
    assert bool(jnp.all(jnp.isfinite(out)))
    print("KERNEL_OK")
</pallas_src>

<mosaic_0001>
module attributes {stable_mosaic.version = 11 : i64} {
  func.func @kernel(%arg0: i32, %arg1: i32, %arg2: i32, %arg3: memref<256x147xbf16, #tpu.memory_space<vmem>>, %arg4: memref<147x64xbf16, #tpu.memory_space<vmem>>, %arg5: memref<1x64xf32, #tpu.memory_space<vmem>>, %arg6: memref<256x64xf32, #tpu.memory_space<vmem>>, %arg7: memref<256x64xf32, #tpu.memory_space<vmem>>) attributes {dimension_semantics = [#tpu.dimension_semantics<parallel>, #tpu.dimension_semantics<parallel>, #tpu.dimension_semantics<arbitrary>], iteration_bounds = array<i64: 8, 1, 1>, scalar_prefetch = 0 : i64, scratch_operands = 1 : i64, tpu.core_type = #tpu.core_type<tc>, window_params = [{transform_indices = @transform_0, window_bounds = array<i64: 256, 147>}, {transform_indices = @transform_1, window_bounds = array<i64: 147, 64>}, {transform_indices = @transform_2, window_bounds = array<i64: 1, 64>}, {transform_indices = @transform_3, window_bounds = array<i64: 256, 64>}]} {
    %c0_i32 = arith.constant 0 : i32
    %0 = arith.cmpi eq, %arg2, %c0_i32 : i32
    %1 = arith.extui %0 : i1 to i32
    %c0_i32_0 = arith.constant 0 : i32
    %2 = arith.cmpi ne, %1, %c0_i32_0 : i32
    scf.if %2 {
      %cst_10 = arith.constant 0.000000e+00 : f32
      %12 = vector.broadcast %cst_10 : f32 to vector<256x64xf32>
      %c0_11 = arith.constant 0 : index
      %c0_12 = arith.constant 0 : index
      %13 = vector.load %arg7[%c0_11, %c0_12] : memref<256x64xf32, #tpu.memory_space<vmem>>, vector<256x64xf32>
      tpu.vector_store %arg7[%c0_11, %c0_12], %12 {strides = array<i32>} : memref<256x64xf32, #tpu.memory_space<vmem>>, vector<256x64xf32>,
    } else {
    }
    %c0 = arith.constant 0 : index
    %c0_1 = arith.constant 0 : index
    %3 = vector.load %arg7[%c0, %c0_1] : memref<256x64xf32, #tpu.memory_space<vmem>>, vector<256x64xf32>
    %c0_2 = arith.constant 0 : index
    %c0_3 = arith.constant 0 : index
    %4 = vector.load %arg3[%c0_2, %c0_3] : memref<256x147xbf16, #tpu.memory_space<vmem>>, vector<256x147xbf16>
    %c0_4 = arith.constant 0 : index
    %c0_5 = arith.constant 0 : index
    %5 = vector.load %arg4[%c0_4, %c0_5] : memref<147x64xbf16, #tpu.memory_space<vmem>>, vector<147x64xbf16>
    %cst = arith.constant dense<0.000000e+00> : vector<256x64xf32>
    %6 = tpu.matmul %4, %5, %cst {dimension_numbers = #tpu.dot_dimension_numbers<[1], [0], [0], [1], [0, 0, 1, 1], [], []>} : vector<256x147xbf16>, vector<147x64xbf16>, vector<256x64xf32> -> vector<256x64xf32>
    %7 = arith.addf %3, %6 : vector<256x64xf32>
    %c0_6 = arith.constant 0 : index
    %c0_7 = arith.constant 0 : index
    %8 = vector.load %arg7[%c0_6, %c0_7] : memref<256x64xf32, #tpu.memory_space<vmem>>, vector<256x64xf32>
    tpu.vector_store %arg7[%c0_6, %c0_7], %7 {strides = array<i32>} : memref<256x64xf32, #tpu.memory_space<vmem>>, vector<256x64xf32>,
    %c0_i32_8 = arith.constant 0 : i32
    %9 = arith.cmpi eq, %arg2, %c0_i32_8 : i32
    %10 = arith.extui %9 : i1 to i32
    %c0_i32_9 = arith.constant 0 : i32
    %11 = arith.cmpi ne, %10, %c0_i32_9 : i32
    scf.if %11 {
      %c0_10 = arith.constant 0 : index
      %c0_11 = arith.constant 0 : index
      %12 = vector.load %arg7[%c0_10, %c0_11] : memref<256x64xf32, #tpu.memory_space<vmem>>, vector<256x64xf32>
      %c0_12 = arith.constant 0 : index
      %c0_13 = arith.constant 0 : index
      %13 = vector.load %arg5[%c0_12, %c0_13] : memref<1x64xf32, #tpu.memory_space<vmem>>, vector<1x64xf32>
      %14 = vector.broadcast %13 : vector<1x64xf32> to vector<256x64xf32>
      %15 = arith.addf %12, %14 : vector<256x64xf32>
      %cst_14 = arith.constant 0.000000e+00 : f32
      %16 = vector.broadcast %cst_14 : f32 to vector<256x64xf32>
      %17 = arith.maximumf %15, %16 : vector<256x64xf32>
      %c0_15 = arith.constant 0 : index
      %c0_16 = arith.constant 0 : index
      %18 = vector.load %arg6[%c0_15, %c0_16] : memref<256x64xf32, #tpu.memory_space<vmem>>, vector<256x64xf32>
      tpu.vector_store %arg6[%c0_15, %c0_16], %17 {strides = array<i32>} : memref<256x64xf32, #tpu.memory_space<vmem>>, vector<256x64xf32>,
    } else {
    }
    return
  }
  func.func @transform_0(%arg0: i32, %arg1: i32, %arg2: i32) -> (i32, i32) {
    %c0_i32 = arith.constant 0 : i32
    return %arg0, %arg2 : i32, i32
  }
  func.func @transform_1(%arg0: i32, %arg1: i32, %arg2: i32) -> (i32, i32) {
    %c0_i32 = arith.constant 0 : i32
    return %arg2, %arg1 : i32, i32
  }
  func.func @transform_2(%arg0: i32, %arg1: i32, %arg2: i32) -> (i32, i32) {
    %c0_i32 = arith.constant 0 : i32
    %c0_i32_0 = arith.constant 0 : i32
    return %c0_i32, %arg1 : i32, i32
  }
  func.func @transform_3(%arg0: i32, %arg1: i32, %arg2: i32) -> (i32, i32) {
    %c0_i32 = arith.constant 0 : i32
    return %arg0, %arg1 : i32, i32
  }
}

</mosaic_0001>

<bundles_post_ra>
// kernel: tpu_custom_call.1
= control target key start
LH: loop header
LB: loop body
LE: loop exit
PB: predicated region body
PF: predicated region fallthrough
CT: control target
= control target key end

     0   :  { %s1456_s12 = smov 0   ;;  %s1458_s13 = smov 0   ;;  %s1781_s0 = inlined_call_operand.vmem [shape: bf16[2048,147], index: 0, kind: input, shape index: {}]   ;;  %s1782_s1 = inlined_call_operand.vmem [shape: bf16[147,64], index: 1, kind: input, shape index: {}]   ;;  %s1783_s2 = inlined_call_operand.vmem [shape: f32[1,64], index: 2, kind: input, shape index: {}]   ;;  %s1784_s3 = inlined_call_operand.vmem [shape: f32[2048,64], index: 3, kind: output, shape index: {}]  }
   0x1   :  { %s1460_s14 = smov 0  }
   0x2 LB: > { %s32_s15 = sadd.s32 1, %s1428_s13  ;;  %p1143_p0 = scmp.ge.s32.totalorder %s1432_s14, 1  ;;  %s1432_s14 = sphi %s1460_s14, %s13_s14   ;;  %s1428_s13 = sphi %s1458_s13, %s1786_s13   ;;  %s1424_s12 = sphi %s1456_s12, %s1785_s12  }
   0x3   : > { %p34_p1 = scmp.ge.s32.totalorder %s32_s15, 8  ;;  %p191_p2 = scmp.lt.s32.totalorder %s1432_s14, 9 }
   0x5   : > { %s1788_s15 = smov (%p34_p1, %s32_s15), 0  ;;  %p192_p3 = pnand %p1143_p0, %p191_p2 }
   0x6   : > { %s1144_s20 = sshll.u32 (!%p192_p3), %s1424_s12, 5 }
   0x7   : > { %195 = sbr.rel (%p192_p3) target bundleno = 313 (0x139), region = 32  ;;  %p236_p4 = scmp.lt.s32.totalorder (!%p192_p3), %s1144_s20, 255 }
   0xc   : > { %v1371_v0 = vld [vmem:[%s1782_s1 + $0x38] sm:$0xff]  ;;  %v387_v1 = vld [vmem:[%s1782_s1 + $0x48] sm:$0x3]  ;;  %vm638_vm0 = vcmask 1040384   ;;  %vm639_vm1 = vcmask 1041408   ;;  %v1370_v3 = vld [vmem:[%s1782_s1 + $0x30] sm:$0xff] }
   0xd   : > { %v569_v2 = vunpack.c.l.b16 %v387_v1  ;;  %645 = vmatpush.bf16.msra.mxu0 %v1371_v0  ;;  %1373 = vmatpush.bf16.msra.mxu2 %v1371_v0  ;;  %v1434_v4 = vmov 65535   ;;  %s1790_s20 = smov (!%p236_p4, %s1144_s20), 255  ;;  %v1369_v9 = vld [vmem:[%s1782_s1 + $0x28] sm:$0xff]  ;;  %v1372_v10 = vld [vmem:[%s1782_s1 + $0x40] sm:$0xff]  ;;  %vm589_vm2 = vcmask 154624   ;;  %v1367_v18 = vld [vmem:[%s1782_s1 + $0x18] sm:$0xff] }
   0xe   : > { %v640_v5 = vsel %vm638_vm0, 4294967295, %v1434_v4  ;;  %s1331_s25 = sshll.u32 %s1790_s20, 3  ;;  %v1368_v14 = vld [vmem:[%s1782_s1 + $0x20] sm:$0xff]  ;;  %v1366_v19 = vld [vmem:[%s1782_s1 + $0x10] sm:$0xff]  ;;  %v1365_v20 = vld [vmem:[%s1782_s1 + $0x8] sm:$0xff]  ;;  %vm272_vm3 = vcmask 523264  }
   0xf   : > { %v579_v6 = vpack.c.b16 %v569_v2, %v569_v2  ;;  %v641_v7 = vsel %vm639_vm1, %v640_v5, 0  ;;  %s1497_s30 = scalar_lea.vmem %s1781_s0, %s1331_s25  ;;  %v1364_v26 = vld [vmem:[%s1782_s1] sm:$0xff]  ;;  %s1641_s22 = scalar_lea.vmem %s1784_s3, %s1331_s25 }
  0x10   : > { %v1332_v11 = vld [vmem:[%s1497_s30 + $0x4] sm:$0xf]  ;;  %v1153_v12 = vld [vmem:[%s1497_s30 + $0x8] sm:$0xf0]  ;;  %v1350_v15 = vld [vmem:[%s1497_s30 + $0x94] sm:$0xf] }
  0x11   : > { %v643_v8 = vand.u32 %v641_v7, %v579_v6  ;;  %646 = vmatpush.bf16.msra.mxu0 %v1370_v3  ;;  %1374 = vmatpush.bf16.msra.mxu2 %v1370_v3  ;;  %v1156_v13 = vor.u32 %v1332_v11, %v1153_v12  ;;  %v1225_v16 = vld [vmem:[%s1497_s30 + $0x98] sm:$0xf0]  ;;  %v1334_v21 = vld [vmem:[%s1497_s30 + $0x14] sm:$0xf]  ;;  %v1352_v23 = vld [vmem:[%s1497_s30 + $0xa4] sm:$0xf] }
  0x12   : > { %v1228_v17 = vor.u32 %v1350_v15, %v1225_v16  ;;  %v1161_v22 = vld [vmem:[%s1497_s30 + $0x18] sm:$0xf0]  ;;  %v1233_v24 = vld [vmem:[%s1497_s30 + $0xa8] sm:$0xf0]  ;;  %v1151_v27 = vld [vmem:[%s1497_s30] sm:$0xf] }
  0x13   : > { %740 = vmatpush.bf16.msra.mxu1 %v643_v8  ;;  %1381 = vmatpush.bf16.msra.mxu3 %v643_v8  ;;  %v1164_v25 = vor.u32 %v1334_v21, %v1161_v22  ;;  %v1333_v28 = vld [vmem:[%s1497_s30 + $0x4] sm:$0xf0]  ;;  %v1215_v29 = vld [vmem:[%s1497_s30 + $0x80] sm:$0xf]  ;;  %v1236_v31 = vor.u32 %v1352_v23, %v1233_v24  ;;  %v1336_v34 = vld [vmem:[%s1497_s30 + $0x24] sm:$0xf] }
  0x14   : > { %v1349_v30 = vld [vmem:[%s1497_s30 + $0x84] sm:$0xf0]  ;;  %v1152_v32 = vor.u32 %v1333_v28, %v1151_v27  ;;  %v1169_v35 = vld [vmem:[%s1497_s30 + $0x28] sm:$0xf0]  ;;  %v1354_v36 = vld [vmem:[%s1497_s30 + $0xb4] sm:$0xf] }
  0x15   : > { %647 = vmatpush.bf16.msra.mxu0 %v1369_v9  ;;  %1375 = vmatpush.bf16.msra.mxu2 %v1369_v9  ;;  %v1216_v33 = vor.u32 %v1349_v30, %v1215_v29  ;;  %v1241_v37 = vld [vmem:[%s1497_s30 + $0xb8] sm:$0xf0]  ;;  %v1172_v38 = vor.u32 %v1336_v34, %v1169_v35  ;;  %v1159_v39 = vld [vmem:[%s1497_s30 + $0x10] sm:$0xf]  ;;  %v1335_v40 = vld [vmem:[%s1497_s30 + $0x14] sm:$0xf0] }
  0x16   : > { %v1223_v41 = vld [vmem:[%s1497_s30 + $0x90] sm:$0xf]  ;;  %v1351_v42 = vld [vmem:[%s1497_s30 + $0x94] sm:$0xf0]  ;;  %v1244_v43 = vor.u32 %v1354_v36, %v1241_v37  ;;  %v1160_v44 = vor.u32 %v1335_v40, %v1159_v39  ;;  %v1338_v46 = vld [vmem:[%s1497_s30 + $0x34] sm:$0xf] }
  0x17   : > { %741 = vmatpush.bf16.msra.mxu1 %v1372_v10  ;;  %1382 = vmatpush.bf16.msra.mxu3 %v1372_v10  ;;  %v1224_v45 = vor.u32 %v1351_v42, %v1223_v41  ;;  %v1177_v47 = vld [vmem:[%s1497_s30 + $0x38] sm:$0xf0]  ;;  %v1356_v48 = vld [vmem:[%s1497_s30 + $0xc4] sm:$0xf]  ;;  %v1249_v49 = vld [vmem:[%s1497_s30 + $0xc8] sm:$0xf0] }
  0x18   : > { %v1180_v50 = vor.u32 %v1338_v46, %v1177_v47  ;;  %v1167_v51 = vld [vmem:[%s1497_s30 + $0x20] sm:$0xf]  ;;  %v1337_v52 = vld [vmem:[%s1497_s30 + $0x24] sm:$0xf0]  ;;  %v1252_v55 = vor.u32 %v1356_v48, %v1249_v49  ;;  %v1340_v58 = vld [vmem:[%s1497_s30 + $0x44] sm:$0xf] }
  0x19   : > { %648 = vmatpush.bf16.msra.mxu0 %v1368_v14  ;;  %1376 = vmatpush.bf16.msra.mxu2 %v1368_v14  ;;  %v1231_v53 = vld [vmem:[%s1497_s30 + $0xa0] sm:$0xf]  ;;  %v1353_v54 = vld [vmem:[%s1497_s30 + $0xa4] sm:$0xf0]  ;;  %v1168_v56 = vor.u32 %v1337_v52, %v1167_v51  ;;  %v1185_v59 = vld [vmem:[%s1497_s30 + $0x48] sm:$0xf0] }
  0x1a   : > { %1313 = vmatmul.msk.bf16.vlgmr.msra.gmra.mxu1 %vm589_vm2, %v1156_v13  ;;  %1322 = vmatmul.msk.bf16.vlgmr.msra.gmra.mxu3 %vm589_vm2, %v1228_v17  ;;  %v1232_v57 = vor.u32 %v1353_v54, %v1231_v53  ;;  %v1358_v60 = vld [vmem:[%s1497_s30 + $0xd4] sm:$0xf]  ;;  %v1257_v61 = vld [vmem:[%s1497_s30 + $0xd8] sm:$0xf0]  ;;  %v1188_v62 = vor.u32 %v1340_v58, %v1185_v59  ;;  %v1175_v63 = vld [vmem:[%s1497_s30 + $0x30] sm:$0xf] }
  0x1b   : > { %v1339_v0 = vld [vmem:[%s1497_s30 + $0x34] sm:$0xf0]  ;;  %v1239_v1 = vld [vmem:[%s1497_s30 + $0xb0] sm:$0xf]  ;;  %v1260_v3 = vor.u32 %v1358_v60, %v1257_v61  ;;  %v1342_v6 = vld [vmem:[%s1497_s30 + $0x54] sm:$0xf] }
  0x1c   : > { %v1355_v2 = vld [vmem:[%s1497_s30 + $0xb4] sm:$0xf0]  ;;  %v1176_v4 = vor.u32 %v1339_v0, %v1175_v63  ;;  %v1193_v7 = vld [vmem:[%s1497_s30 + $0x58] sm:$0xf0]  ;;  %v1360_v8 = vld [vmem:[%s1497_s30 + $0xe4] sm:$0xf] }
  0x1d   : > { %649 = vmatpush.bf16.msra.mxu0 %v1367_v18  ;;  %1377 = vmatpush.bf16.msra.mxu2 %v1367_v18  ;;  %v1240_v5 = vor.u32 %v1355_v2, %v1239_v1  ;;  %v1265_v9 = vld [vmem:[%s1497_s30 + $0xe8] sm:$0xf0]  ;;  %v1196_v10 = vor.u32 %v1342_v6, %v1193_v7  ;;  %v1183_v11 = vld [vmem:[%s1497_s30 + $0x40] sm:$0xf]  ;;  %v1341_v12 = vld [vmem:[%s1497_s30 + $0x44] sm:$0xf0] }
  0x1e   : > { %v1247_v13 = vld [vmem:[%s1497_s30 + $0xc0] sm:$0xf]  ;;  %v1357_v14 = vld [vmem:[%s1497_s30 + $0xc4] sm:$0xf0]  ;;  %v1268_v15 = vor.u32 %v1360_v8, %v1265_v9  ;;  %v1184_v16 = vor.u32 %v1341_v12, %v1183_v11  ;;  %v1344_v18 = vld [vmem:[%s1497_s30 + $0x64] sm:$0xf] }
  0x1f   : > { %v1248_v17 = vor.u32 %v1357_v14, %v1247_v13  ;;  %v1273_v21 = vld [vmem:[%s1497_s30 + $0xf8] sm:$0xf0]  ;;  %v1191_v23 = vld [vmem:[%s1497_s30 + $0x50] sm:$0xf]  ;;  %v1343_v24 = vld [vmem:[%s1497_s30 + $0x54] sm:$0xf0] }
  0x20   : > { %v1192_v28 = vor.u32 %v1343_v24, %v1191_v23  ;;  %v1346_v30 = vld [vmem:[%s1497_s30 + $0x74] sm:$0xf]  ;;  %v1345_v34 = vld [vmem:[%s1497_s30 + $0x64] sm:$0xf0]  ;;  %v1435_v35 = vmov 0.0  }
  0x21   : > { %650 = vmatpush.bf16.msra.mxu0 %v1366_v19  ;;  %1378 = vmatpush.bf16.msra.mxu2 %v1366_v19  ;;  %v1201_v19 = vld [vmem:[%s1497_s30 + $0x68] sm:$0xf0]  ;;  %273 = vst.msk [vmem:[#allocation2] sm:$0xff] %vm272_vm3, %v1435_v35  ;;  %v1263_v36 = vld [vmem:[%s1497_s30 + $0xe0] sm:$0xf] }
  0x22   : > { %v1204_v22 = vor.u32 %v1344_v18, %v1201_v19  ;;  %v1361_v37 = vld [vmem:[%s1497_s30 + $0xe4] sm:$0xf0]  ;;  %274 = vst.msk [vmem:[#allocation2 + $0x8] sm:$0xff] %vm272_vm3, %v1435_v35  ;;  %v1348_v40 = vld [vmem:[%s1497_s30 + $0x84] sm:$0xf] }
  0x23   : > { %275 = vst.msk [vmem:[#allocation2 + $0x10] sm:$0xff] %vm272_vm3, %v1435_v35  ;;  %v1264_v39 = vor.u32 %v1361_v37, %v1263_v36  ;;  %v1217_v41 = vld [vmem:[%s1497_s30 + $0x88] sm:$0xf0]  ;;  %v1271_v46 = vld [vmem:[%s1497_s30 + $0xf0] sm:$0xf] }
  0x24   : > { %276 = vst.msk [vmem:[#allocation2 + $0x18] sm:$0xff] %vm272_vm3, %v1435_v35  ;;  %v1220_v42 = vor.u32 %v1348_v40, %v1217_v41  ;;  %v1363_v47 = vld [vmem:[%s1497_s30 + $0xf4] sm:$0xf0] }
  0x25   : > { %651 = vmatpush.bf16.msra.mxu0 %v1365_v20  ;;  %1379 = vmatpush.bf16.msra.mxu2 %v1365_v20  ;;  %v1362_v20 = vld [vmem:[%s1497_s30 + $0xf4] sm:$0xf]  ;;  %277 = vst.msk [vmem:[#allocation2 + $0x20] sm:$0xff] %vm272_vm3, %v1435_v35  ;;  %v1272_v49 = vor.u32 %v1363_v47, %v1271_v46 }
  0x26   : > { %v1276_v27 = vor.u32 %v1362_v20, %v1273_v21  ;;  %278 = vst.msk [vmem:[#allocation2 + $0x28] sm:$0xff] %vm272_vm3, %v1435_v35 }
  0x27   : > { %279 = vst.msk [vmem:[#allocation2 + $0x30] sm:$0xff] %vm272_vm3, %v1435_v35 }
  0x28   : > { %280 = vst.msk [vmem:[#allocation2 + $0x38] sm:$0xff] %vm272_vm3, %v1435_v35  ;;  %v305_v53 = vld [vmem:[#allocation2] sm:$0xff] }
  0x29   : > { %652 = vmatpush.bf16.msra.mxu0 %v1364_v26  ;;  %1380 = vmatpush.bf16.msra.mxu2 %v1364_v26  ;;  %v1359_v26 = vld [vmem:[%s1497_s30 + $0xd4] sm:$0xf0]  ;;  %281 = vst.msk [vmem:[#allocation2 + $0x40] sm:$0xff] %vm272_vm3, %v1435_v35  ;;  %v306_v60 = vld [vmem:[#allocation2 + $0x8] sm:$0xff] }
  0x2a   : > { %1314 = vmatmul.msk.bf16.gmra.mxu1 %vm589_vm2, %v1164_v25  ;;  %1323 = vmatmul.msk.bf16.gmra.mxu3 %vm589_vm2, %v1236_v31  ;;  %v1255_v25 = vld [vmem:[%s1497_s30 + $0xd0] sm:$0xf]  ;;  %v1209_v31 = vld [vmem:[%s1497_s30 + $0x78] sm:$0xf0]  ;;  %282 = vst.msk [vmem:[#allocation2 + $0x48] sm:$0xff] %vm272_vm3, %v1435_v35 }
  0x2b   : > { %v1256_v29 = vor.u32 %v1359_v26, %v1255_v25  ;;  %283 = vst.msk [vmem:[#allocation2 + $0x50] sm:$0xff] %vm272_vm3, %v1435_v35  ;;  %v307_v6 = vld [vmem:[#allocation2 + $0x10] sm:$0xff]  ;;  %v308_v18 = vld [vmem:[#allocation2 + $0x18] sm:$0xff] }
  0x2c   : > { %653 = vmatmul.bf16.vlgmr.msra.gmra.mxu0 %v1152_v32  ;;  %693 = vmatmul.bf16.vlgmr.msra.gmra.mxu2 %v1216_v33  ;;  %v1212_v32 = vor.u32 %v1346_v30, %v1209_v31  ;;  %v1199_v33 = vld [vmem:[%s1497_s30 + $0x60] sm:$0xf]  ;;  %284 = vst.msk [vmem:[#allocation2 + $0x58] sm:$0xff] %vm272_vm3, %v1435_v35 }
  0x2d   : > { %285 = vst.msk [vmem:[#allocation2 + $0x60] sm:$0xff] %vm272_vm3, %v1435_v35  ;;  %v309_v31 = vld [vmem:[#allocation2 + $0x20] sm:$0xff]  ;;  %v310_v47 = vld [vmem:[#allocation2 + $0x28] sm:$0xff] }
  0x2e   : > { %286 = vst.msk [vmem:[#allocation2 + $0x68] sm:$0xff] %vm272_vm3, %v1435_v35 }
  0x2f   : > { %287 = vst.msk [vmem:[#allocation2 + $0x70] sm:$0xff] %vm272_vm3, %v1435_v35 }
  0x30   : > { %288 = vst.msk [vmem:[#allocation2 + $0x78] sm:$0xff] %vm272_vm3, %v1435_v35 }
  0x31   : > { %289 = vst.msk [vmem:[#allocation2 + $0x80] sm:$0xff] %vm272_vm3, %v1435_v35 }
  0x32   : > { %290 = vst.msk [vmem:[#allocation2 + $0x88] sm:$0xff] %vm272_vm3, %v1435_v35 }
  0x33   : > { %291 = vst.msk [vmem:[#allocation2 + $0x90] sm:$0xff] %vm272_vm3, %v1435_v35 }
  0x34   : > { %292 = vst.msk [vmem:[#allocation2 + $0x98] sm:$0xff] %vm272_vm3, %v1435_v35 }
  0x35   : > { %293 = vst.msk [vmem:[#allocation2 + $0xa0] sm:$0xff] %vm272_vm3, %v1435_v35 }
  0x36   : > { %294 = vst.msk [vmem:[#allocation2 + $0xa8] sm:$0xff] %vm272_vm3, %v1435_v35 }
  0x37   : > { %295 = vst.msk [vmem:[#allocation2 + $0xb0] sm:$0xff] %vm272_vm3, %v1435_v35 }
  0x38   : > { %296 = vst.msk [vmem:[#allocation2 + $0xb8] sm:$0xff] %vm272_vm3, %v1435_v35 }
  0x39   : > { %297 = vst.msk [vmem:[#allocation2 + $0xc0] sm:$0xff] %vm272_vm3, %v1435_v35 }
  0x3a   : > { %1315 = vmatmul.msk.bf16.gmra.mxu1 %vm589_vm2, %v1172_v38  ;;  %1324 = vmatmul.msk.bf16.gmra.mxu3 %vm589_vm2, %v1244_v43  ;;  %v1200_v38 = vor.u32 %v1345_v34, %v1199_v33  ;;  %v1207_v43 = vld [vmem:[%s1497_s30 + $0x70] sm:$0xf]  ;;  %298 = vst.msk [vmem:[#allocation2 + $0xc8] sm:$0xff] %vm272_vm3, %v1435_v35 }
  0x3b   : > { %299 = vst.msk [vmem:[#allocation2 + $0xd0] sm:$0xff] %vm272_vm3, %v1435_v35 }
  0x3c   : > { %658 = vmatmul.bf16.gmra.mxu0 %v1160_v44  ;;  %698 = vmatmul.bf16.gmra.mxu2 %v1224_v45  ;;  %v1347_v44 = vld [vmem:[%s1497_s30 + $0x74] sm:$0xf0]  ;;  %300 = vst.msk [vmem:[#allocation2 + $0xd8] sm:$0xff] %vm272_vm3, %v1435_v35 }
  0x3d   : > { %v1208_v48 = vor.u32 %v1347_v44, %v1207_v43  ;;  %301 = vst.msk [vmem:[#allocation2 + $0xe0] sm:$0xff] %vm272_vm3, %v1435_v35  ;;  %v325_v44 = vld [vmem:[#allocation2 + $0xa0] sm:$0xff] }
  0x3e   : > { %302 = vst.msk [vmem:[#allocation2 + $0xe8] sm:$0xff] %vm272_vm3, %v1435_v35 }
  0x3f   : > { %303 = vst.msk [vmem:[#allocation2 + $0xf0] sm:$0xff] %vm272_vm3, %v1435_v35 }
  0x40   : > { %304 = vst.msk [vmem:[#allocation2 + $0xf8] sm:$0xff] %vm272_vm3, %v1435_v35 }
  0x4a   : > { %1316 = vmatmul.msk.bf16.gmra.mxu1 %vm589_vm2, %v1180_v50  ;;  %1325 = vmatmul.msk.bf16.gmra.mxu3 %vm589_vm2, %v1252_v55 }
  0x4c   : > { %663 = vmatmul.bf16.gmra.mxu0 %v1168_v56  ;;  %703 = vmatmul.bf16.gmra.mxu2 %v1232_v57 }
  0x5a   : > { %1317 = vmatmul.msk.bf16.gmra.mxu1 %vm589_vm2, %v1188_v62  ;;  %1326 = vmatmul.msk.bf16.gmra.mxu3 %vm589_vm2, %v1260_v3  ;;  %v1632_v62 = vld [vmem:[%s1783_s2] ss:$0 sm:$0xff] }
  0x5c   : > { %668 = vmatmul.bf16.gmra.mxu0 %v1176_v4  ;;  %708 = vmatmul.bf16.gmra.mxu2 %v1240_v5 }
  0x6a   : > { %1318 = vmatmul.msk.bf16.gmra.mxu1 %vm589_vm2, %v1196_v10  ;;  %1327 = vmatmul.msk.bf16.gmra.mxu3 %vm589_vm2, %v1268_v15  ;;  %v323_v15 = vld [vmem:[#allocation2 + $0x90] sm:$0xff] }
  0x6c   : > { %673 = vmatmul.bf16.gmra.mxu0 %v1184_v16  ;;  %713 = vmatmul.bf16.gmra.mxu2 %v1248_v17 }
  0x7a   : > { %1319 = vmatmul.msk.bf16.gmra.mxu1 %vm589_vm2, %v1204_v22  ;;  %1328 = vmatmul.msk.bf16.gmra.mxu3 %vm589_vm2, %v1276_v27 }
  0x7c   : > { %678 = vmatmul.bf16.gmra.mxu0 %v1192_v28  ;;  %718 = vmatmul.bf16.gmra.mxu2 %v1256_v29  ;;  %v324_v28 = vld [vmem:[#allocation2 + $0x98] sm:$0xff] }
  0x8a   : > { %1320 = vmatmul.msk.bf16.gmra.mxu1 %vm589_vm2, %v1212_v32 }
  0x8c   : > { %683 = vmatmul.bf16.gmra.mxu0 %v1200_v38  ;;  %723 = vmatmul.bf16.gmra.mxu2 %v1264_v39 }
  0x97   : > { %v743_v45 = vpop.f32.mrf.mxu1 }
  0x9a   : > { %1321 = vmatmul.msk.bf16.gmra.mxu1 %vm589_vm2, %v1220_v42 }
  0x9c   : > { %688 = vmatmul.bf16.gmra.mxu0 %v1208_v48  ;;  %728 = vmatmul.bf16.gmra.mxu2 %v1272_v49 }
  0x9d   : > { %v788_v52 = vpop.f32.mrf.mxu3 }
  0x9f   : > { %v745_v50 = vpop.f32.mrf.mxu1 }
  0xa5   : > { %v790_v59 = vpop.f32.mrf.mxu3 }
  0xa7   : > { %v748_v51 = vpop.f32.mrf.mxu1 }
  0xa9   : > { %v654_v54 = vpop.f32.mrf.mxu0 }
  0xaa   : > { %v744_v55 = vadd.f32 %v743_v45, %v654_v54 }
  0xac   : > { %v823_v56 = vadd.f32 %v744_v55, %v305_v53 }
  0xad   : > { %v793_v9 = vpop.f32.mrf.mxu3 }
  0xae   : > { %856 = vst.msk [vmem:[#allocation2] sm:$0xff] %vm272_vm3, %v823_v56 }
  0xaf   : > { %v750_v57 = vpop.f32.mrf.mxu1  ;;  %v1627_v58 = vpop.f32.mrf.mxu2 }
  0xb1   : > { %v656_v61 = vpop.f32.mrf.mxu0 }
  0xb2   : > { %v746_v63 = vadd.f32 %v745_v50, %v656_v61 }
  0xb4   : > { %v824_v0 = vadd.f32 %v746_v63, %v306_v60  ;;  %v326_v60 = vld [vmem:[#allocation2 + $0xa8] sm:$0xff] }
  0xb5   : > { %v891_v1 = vld [vmem:[#allocation2] sm:$0xff]  ;;  %v795_v23 = vpop.f32.mrf.mxu3 }
  0xb6   : > { %v927_v2 = vadd.f32 %v1632_v62, %v891_v1  ;;  %857 = vst.msk [vmem:[#allocation2 + $0x8] sm:$0xff] %vm272_vm3, %v824_v0  ;;  %v311_v1 = vld [vmem:[#allocation2 + $0x30] sm:$0xff] }
  0xb7   : > { %v753_v3 = vpop.f32.mrf.mxu1  ;;  %v1643_v5 = vpop.f32.mrf.mxu2 }
  0xb8   : > { %v959_v4 = vmax.f32 %v927_v2, 0.0 }
  0xb9   : > { %v659_v7 = vpop.f32.mrf.mxu0 }
  0xba   : > { %991 = vst.msk [vmem:[%s1641_s22] sm:$0xff] %vm272_vm3, %v959_v4  ;;  %v749_v8 = vadd.f32 %v748_v51, %v659_v7 }
  0xbc   : > { %v825_v10 = vadd.f32 %v749_v8, %v307_v6 }
  0xbd   : > { %v892_v11 = vld [vmem:[#allocation2 + $0x8] sm:$0xff]  ;;  %v798_v41 = vpop.f32.mrf.mxu3 }
  0xbe   : > { %v928_v12 = vadd.f32 %v1632_v62, %v892_v11  ;;  %858 = vst.msk [vmem:[#allocation2 + $0x10] sm:$0xff] %vm272_vm3, %v825_v10 }
  0xbf   : > { %v755_v13 = vpop.f32.mrf.mxu1  ;;  %v699_v16 = vpop.f32.mrf.mxu2 }
  0xc0   : > { %v960_v14 = vmax.f32 %v928_v12, 0.0  ;;  %v789_v17 = vadd.f32 %v788_v52, %v699_v16 }
  0xc1   : > { %v661_v19 = vpop.f32.mrf.mxu0 }
  0xc2   : > { %992 = vst.msk [vmem:[%s1641_s22 + $0x8] sm:$0xff] %vm272_vm3, %v960_v14  ;;  %v751_v20 = vadd.f32 %v750_v57, %v661_v19  ;;  %v841_v21 = vadd.f32 %v789_v17, %v323_v15  ;;  %v327_v14 = vld [vmem:[#allocation2 + $0xb0] sm:$0xff]  ;;  %v312_v17 = vld [vmem:[#allocation2 + $0x38] sm:$0xff] }
  0xc4   : > { %v826_v22 = vadd.f32 %v751_v20, %v308_v18  ;;  %874 = vst.msk [vmem:[#allocation2 + $0x90] sm:$0xff] %vm272_vm3, %v841_v21 }
  0xc5   : > { %v893_v24 = vld [vmem:[#allocation2 + $0x10] sm:$0xff]  ;;  %v800_v63 = vpop.f32.mrf.mxu3 }
  0xc6   : > { %v929_v25 = vadd.f32 %v1632_v62, %v893_v24  ;;  %859 = vst.msk [vmem:[#allocation2 + $0x18] sm:$0xff] %vm272_vm3, %v826_v22 }
  0xc7   : > { %v758_v26 = vpop.f32.mrf.mxu1  ;;  %v701_v29 = vpop.f32.mrf.mxu2 }
  0xc8   : > { %v961_v27 = vmax.f32 %v929_v25, 0.0  ;;  %v791_v30 = vadd.f32 %v790_v59, %v701_v29 }
  0xc9   : > { %v664_v32 = vpop.f32.mrf.mxu0 }
  0xca   : > { %993 = vst.msk [vmem:[%s1641_s22 + $0x10] sm:$0xff] %vm272_vm3, %v961_v27  ;;  %v754_v33 = vadd.f32 %v753_v3, %v664_v32  ;;  %v842_v34 = vadd.f32 %v791_v30, %v324_v28  ;;  %v328_v30 = vld [vmem:[#allocation2 + $0xb8] sm:$0xff] }
  0xcb   : > { %v909_v35 = vld [vmem:[#allocation2 + $0x90] sm:$0xff] }
  0xcc   : > { %v827_v36 = vadd.f32 %v754_v33, %v309_v31  ;;  %v945_v37 = vadd.f32 %v1632_v62, %v909_v35  ;;  %875 = vst.msk [vmem:[#allocation2 + $0x98] sm:$0xff] %vm272_vm3, %v842_v34  ;;  %v313_v33 = vld [vmem:[#allocation2 + $0x40] sm:$0xff] }
  0xcd   : > { %v894_v38 = vld [vmem:[#allocation2 + $0x18] sm:$0xff]  ;;  %v803_v20 = vpop.f32.mrf.mxu3 }
  0xce   : > { %v930_v39 = vadd.f32 %v1632_v62, %v894_v38  ;;  %860 = vst.msk [vmem:[#allocation2 + $0x20] sm:$0xff] %vm272_vm3, %v827_v36  ;;  %v977_v42 = vmax.f32 %v945_v37, 0.0 }
  0xcf   : > { %v760_v40 = vpop.f32.mrf.mxu1  ;;  %v704_v45 = vpop.f32.mrf.mxu2 }
  0xd0   : > { %v962_v43 = vmax.f32 %v930_v39, 0.0  ;;  %1009 = vst.msk [vmem:[%s1641_s22 + $0x90] sm:$0xff] %vm272_vm3, %v977_v42  ;;  %v794_v46 = vadd.f32 %v793_v9, %v704_v45 }
  0xd1   : > { %v666_v48 = vpop.f32.mrf.mxu0 }
  0xd2   : > { %994 = vst.msk [vmem:[%s1641_s22 + $0x18] sm:$0xff] %vm272_vm3, %v962_v43  ;;  %v756_v49 = vadd.f32 %v755_v13, %v666_v48  ;;  %v843_v50 = vadd.f32 %v794_v46, %v325_v44  ;;  %v329_v46 = vld [vmem:[#allocation2 + $0xc0] sm:$0xff] }
  0xd3   : > { %v910_v51 = vld [vmem:[#allocation2 + $0x98] sm:$0xff] }
  0xd4   : > { %v828_v52 = vadd.f32 %v756_v49, %v310_v47  ;;  %v946_v53 = vadd.f32 %v1632_v62, %v910_v51  ;;  %876 = vst.msk [vmem:[#allocation2 + $0xa0] sm:$0xff] %vm272_vm3, %v843_v50  ;;  %v314_v49 = vld [vmem:[#allocation2 + $0x48] sm:$0xff] }
  0xd5   : > { %v895_v54 = vld [vmem:[#allocation2 + $0x20] sm:$0xff]  ;;  %v805_v39 = vpop.f32.mrf.mxu3 }
  0xd6   : > { %v931_v55 = vadd.f32 %v1632_v62, %v895_v54  ;;  %861 = vst.msk [vmem:[#allocation2 + $0x28] sm:$0xff] %vm272_vm3, %v828_v52  ;;  %v978_v57 = vmax.f32 %v946_v53, 0.0 }
  0xd7   : > { %v763_v56 = vpop.f32.mrf.mxu1  ;;  %v706_v61 = vpop.f32.mrf.mxu2 }
  0xd8   : > { %v963_v59 = vmax.f32 %v931_v55, 0.0  ;;  %1010 = vst.msk [vmem:[%s1641_s22 + $0x98] sm:$0xff] %vm272_vm3, %v978_v57  ;;  %v796_v0 = vadd.f32 %v795_v23, %v706_v61 }
  0xd9   : > { %v669_v2 = vpop.f32.mrf.mxu0 }
  0xda   : > { %995 = vst.msk [vmem:[%s1641_s22 + $0x20] sm:$0xff] %vm272_vm3, %v963_v59  ;;  %v759_v3 = vadd.f32 %v758_v26, %v669_v2  ;;  %v844_v4 = vadd.f32 %v796_v0, %v326_v60  ;;  %v330_v0 = vld [vmem:[#allocation2 + $0xc8] sm:$0xff] }
  0xdb   : > { %v911_v6 = vld [vmem:[#allocation2 + $0xa0] sm:$0xff] }
  0xdc   : > { %v829_v7 = vadd.f32 %v759_v3, %v311_v1  ;;  %v947_v8 = vadd.f32 %v1632_v62, %v911_v6  ;;  %877 = vst.msk [vmem:[#allocation2 + $0xa8] sm:$0xff] %vm272_vm3, %v844_v4  ;;  %v315_v3 = vld [vmem:[#allocation2 + $0x50] sm:$0xff] }
  0xdd   : > { %v896_v9 = vld [vmem:[#allocation2 + $0x28] sm:$0xff]  ;;  %v808_v60 = vpop.f32.mrf.mxu3 }
  0xde   : > { %v932_v10 = vadd.f32 %v1632_v62, %v896_v9  ;;  %862 = vst.msk [vmem:[#allocation2 + $0x30] sm:$0xff] %vm272_vm3, %v829_v7  ;;  %v979_v12 = vmax.f32 %v947_v8, 0.0 }
  0xdf   : > { %v765_v11 = vpop.f32.mrf.mxu1  ;;  %v709_v15 = vpop.f32.mrf.mxu2 }
  0xe0   : > { %v964_v13 = vmax.f32 %v932_v10, 0.0  ;;  %1011 = vst.msk [vmem:[%s1641_s22 + $0xa0] sm:$0xff] %vm272_vm3, %v979_v12  ;;  %v799_v16 = vadd.f32 %v798_v41, %v709_v15 }
  0xe1   : > { %v671_v18 = vpop.f32.mrf.mxu0 }
  0xe2   : > { %996 = vst.msk [vmem:[%s1641_s22 + $0x28] sm:$0xff] %vm272_vm3, %v964_v13  ;;  %v761_v19 = vadd.f32 %v760_v40, %v671_v18  ;;  %v845_v21 = vadd.f32 %v799_v16, %v327_v14  ;;  %v331_v16 = vld [vmem:[#allocation2 + $0xd0] sm:$0xff] }
  0xe3   : > { %v912_v22 = vld [vmem:[#allocation2 + $0xa8] sm:$0xff] }
  0xe4   : > { %v830_v23 = vadd.f32 %v761_v19, %v312_v17  ;;  %v948_v24 = vadd.f32 %v1632_v62, %v912_v22  ;;  %878 = vst.msk [vmem:[#allocation2 + $0xb0] sm:$0xff] %vm272_vm3, %v845_v21 }
  0xe5   : > { %v897_v25 = vld [vmem:[#allocation2 + $0x30] sm:$0xff]  ;;  %v810_v18 = vpop.f32.mrf.mxu3 }
  0xe6   : > { %v933_v26 = vadd.f32 %v1632_v62, %v897_v25  ;;  %863 = vst.msk [vmem:[#allocation2 + $0x38] sm:$0xff] %vm272_vm3, %v830_v23  ;;  %v980_v28 = vmax.f32 %v948_v24, 0.0 }
  0xe7   : > { %v768_v27 = vpop.f32.mrf.mxu1  ;;  %v711_v31 = vpop.f32.mrf.mxu2 }
  0xe8   : > { %v965_v29 = vmax.f32 %v933_v26, 0.0  ;;  %1012 = vst.msk [vmem:[%s1641_s22 + $0xa8] sm:$0xff] %vm272_vm3, %v980_v28  ;;  %v801_v32 = vadd.f32 %v800_v63, %v711_v31 }
  0xe9   : > { %v674_v34 = vpop.f32.mrf.mxu0 }
  0xea   : > { %997 = vst.msk [vmem:[%s1641_s22 + $0x30] sm:$0xff] %vm272_vm3, %v965_v29  ;;  %v764_v35 = vadd.f32 %v763_v56, %v674_v34  ;;  %v846_v36 = vadd.f32 %v801_v32, %v328_v30  ;;  %v332_v32 = vld [vmem:[#allocation2 + $0xd8] sm:$0xff] }
  0xeb   : > { %v913_v37 = vld [vmem:[#allocation2 + $0xb0] sm:$0xff] }
  0xec   : > { %v831_v38 = vadd.f32 %v764_v35, %v313_v33  ;;  %v949_v40 = vadd.f32 %v1632_v62, %v913_v37  ;;  %879 = vst.msk [vmem:[#allocation2 + $0xb8] sm:$0xff] %vm272_vm3, %v846_v36  ;;  %v317_v35 = vld [vmem:[#allocation2 + $0x60] sm:$0xff] }
  0xed   : > { %v898_v41 = vld [vmem:[#allocation2 + $0x38] sm:$0xff]  ;;  %v813_v37 = vpop.f32.mrf.mxu3 }
  0xee   : > { %v934_v42 = vadd.f32 %v1632_v62, %v898_v41  ;;  %864 = vst.msk [vmem:[#allocation2 + $0x40] sm:$0xff] %vm272_vm3, %v831_v38  ;;  %v981_v44 = vmax.f32 %v949_v40, 0.0 }
  0xef   : > { %v770_v43 = vpop.f32.mrf.mxu1  ;;  %v714_v47 = vpop.f32.mrf.mxu2 }
  0xf0   : > { %v966_v45 = vmax.f32 %v934_v42, 0.0  ;;  %1013 = vst.msk [vmem:[%s1641_s22 + $0xb0] sm:$0xff] %vm272_vm3, %v981_v44  ;;  %v804_v48 = vadd.f32 %v803_v20, %v714_v47  ;;  %v316_v20 = vld [vmem:[#allocation2 + $0x58] sm:$0xff] }
  0xf1   : > { %v676_v50 = vpop.f32.mrf.mxu0 }
  0xf2   : > { %998 = vst.msk [vmem:[%s1641_s22 + $0x38] sm:$0xff] %vm272_vm3, %v966_v45  ;;  %v766_v51 = vadd.f32 %v765_v11, %v676_v50  ;;  %v847_v52 = vadd.f32 %v804_v48, %v329_v46  ;;  %v333_v48 = vld [vmem:[#allocation2 + $0xe0] sm:$0xff] }
  0xf3   : > { %v914_v53 = vld [vmem:[#allocation2 + $0xb8] sm:$0xff] }
  0xf4   : > { %v832_v54 = vadd.f32 %v766_v51, %v314_v49  ;;  %v950_v55 = vadd.f32 %v1632_v62, %v914_v53  ;;  %880 = vst.msk [vmem:[#allocation2 + $0xc0] sm:$0xff] %vm272_vm3, %v847_v52  ;;  %v318_v51 = vld [vmem:[#allocation2 + $0x68] sm:$0xff] }
  0xf5   : > { %v899_v56 = vld [vmem:[#allocation2 + $0x40] sm:$0xff] }
  0xf6   : > { %v935_v57 = vadd.f32 %v1632_v62, %v899_v56  ;;  %865 = vst.msk [vmem:[#allocation2 + $0x48] sm:$0xff] %vm272_vm3, %v832_v54  ;;  %v982_v61 = vmax.f32 %v950_v55, 0.0  ;;  %v815_v56 = vpop.f32.mrf.mxu3 }
  0xf7   : > { %v773_v59 = vpop.f32.mrf.mxu1  ;;  %v716_v1 = vpop.f32.mrf.mxu2 }
  0xf8   : > { %v967_v63 = vmax.f32 %v935_v57, 0.0  ;;  %1014 = vst.msk [vmem:[%s1641_s22 + $0xb8] sm:$0xff] %vm272_vm3, %v982_v61  ;;  %v806_v2 = vadd.f32 %v805_v39, %v716_v1 }
  0xf9   : > { %v679_v4 = vpop.f32.mrf.mxu0 }
  0xfa   : > { %999 = vst.msk [vmem:[%s1641_s22 + $0x40] sm:$0xff] %vm272_vm3, %v967_v63  ;;  %v769_v6 = vadd.f32 %v768_v27, %v679_v4  ;;  %v848_v7 = vadd.f32 %v806_v2, %v330_v0  ;;  %v321_v63 = vld [vmem:[#allocation2 + $0x80] sm:$0xff]  ;;  %v334_v4 = vld [vmem:[#allocation2 + $0xe8] sm:$0xff] }
  0xfb   : > { %v915_v8 = vld [vmem:[#allocation2 + $0xc0] sm:$0xff] }
  0xfc   : > { %v833_v9 = vadd.f32 %v769_v6, %v315_v3  ;;  %v951_v10 = vadd.f32 %v1632_v62, %v915_v8  ;;  %881 = vst.msk [vmem:[#allocation2 + $0xc8] sm:$0xff] %vm272_vm3, %v848_v7 }
  0xfd   : > { %v900_v11 = vld [vmem:[#allocation2 + $0x48] sm:$0xff] }
  0xfe   : > { %v936_v12 = vadd.f32 %v1632_v62, %v900_v11  ;;  %866 = vst.msk [vmem:[#allocation2 + $0x50] sm:$0xff] %vm272_vm3, %v833_v9  ;;  %v983_v14 = vmax.f32 %v951_v10, 0.0  ;;  %v319_v9 = vld [vmem:[#allocation2 + $0x70] sm:$0xff] }
  0xff   : > { %v775_v13 = vpop.f32.mrf.mxu1  ;;  %v719_v17 = vpop.f32.mrf.mxu2 }
 0x100   : > { %v968_v15 = vmax.f32 %v936_v12, 0.0  ;;  %1015 = vst.msk [vmem:[%s1641_s22 + $0xc0] sm:$0xff] %vm272_vm3, %v983_v14  ;;  %v809_v19 = vadd.f32 %v808_v60, %v719_v17  ;;  %v818_v17 = vpop.f32.mrf.mxu3 }
 0x101   : > { %v681_v21 = vpop.f32.mrf.mxu0 }
 0x102   : > { %1000 = vst.msk [vmem:[%s1641_s22 + $0x48] sm:$0xff] %vm272_vm3, %v968_v15  ;;  %v771_v22 = vadd.f32 %v770_v43, %v681_v21  ;;  %v849_v23 = vadd.f32 %v809_v19, %v331_v16 }
 0x103   : > { %v916_v24 = vld [vmem:[#allocation2 + $0xc8] sm:$0xff] }
 0x104   : > { %v834_v25 = vadd.f32 %v771_v22, %v316_v20  ;;  %v952_v26 = vadd.f32 %v1632_v62, %v916_v24  ;;  %882 = vst.msk [vmem:[#allocation2 + $0xd0] sm:$0xff] %vm272_vm3, %v849_v23  ;;  %v335_v23 = vld [vmem:[#allocation2 + $0xf0] sm:$0xff] }
 0x105   : > { %v901_v27 = vld [vmem:[#allocation2 + $0x50] sm:$0xff] }
 0x106   : > { %v937_v28 = vadd.f32 %v1632_v62, %v901_v27  ;;  %867 = vst.msk [vmem:[#allocation2 + $0x58] sm:$0xff] %vm272_vm3, %v834_v25  ;;  %v984_v30 = vmax.f32 %v952_v26, 0.0  ;;  %v320_v27 = vld [vmem:[#allocation2 + $0x78] sm:$0xff] }
 0x107   : > { %v778_v29 = vpop.f32.mrf.mxu1  ;;  %v721_v33 = vpop.f32.mrf.mxu2 }
 0x108   : > { %v969_v31 = vmax.f32 %v937_v28, 0.0  ;;  %1016 = vst.msk [vmem:[%s1641_s22 + $0xc8] sm:$0xff] %vm272_vm3, %v984_v30  ;;  %v811_v34 = vadd.f32 %v810_v18, %v721_v33  ;;  %v322_v18 = vld [vmem:[#allocation2 + $0x88] sm:$0xff] }
 0x109   : > { %v684_v36 = vpop.f32.mrf.mxu0 }
 0x10a   : > { %1001 = vst.msk [vmem:[%s1641_s22 + $0x50] sm:$0xff] %vm272_vm3, %v969_v31  ;;  %v774_v38 = vadd.f32 %v773_v59, %v684_v36  ;;  %v850_v39 = vadd.f32 %v811_v34, %v332_v32 }
 0x10b   : > { %v917_v40 = vld [vmem:[#allocation2 + $0xd0] sm:$0xff] }
 0x10c   : > { %v835_v41 = vadd.f32 %v774_v38, %v317_v35  ;;  %v953_v42 = vadd.f32 %v1632_v62, %v917_v40  ;;  %883 = vst.msk [vmem:[#allocation2 + $0xd8] sm:$0xff] %vm272_vm3, %v850_v39  ;;  %v820_v40 = vpop.f32.mrf.mxu3 }
 0x10d   : > { %v902_v43 = vld [vmem:[#allocation2 + $0x58] sm:$0xff] }
 0x10e   : > { %v938_v44 = vadd.f32 %v1632_v62, %v902_v43  ;;  %868 = vst.msk [vmem:[#allocation2 + $0x60] sm:$0xff] %vm272_vm3, %v835_v41  ;;  %v985_v46 = vmax.f32 %v953_v42, 0.0  ;;  %v336_v41 = vld [vmem:[#allocation2 + $0xf8] sm:$0xff] }
 0x10f   : > { %v780_v45 = vpop.f32.mrf.mxu1  ;;  %v724_v49 = vpop.f32.mrf.mxu2 }
 0x110   : > { %v970_v47 = vmax.f32 %v938_v44, 0.0  ;;  %1017 = vst.msk [vmem:[%s1641_s22 + $0xd0] sm:$0xff] %vm272_vm3, %v985_v46  ;;  %v814_v50 = vadd.f32 %v813_v37, %v724_v49 }
 0x111   : > { %v686_v52 = vpop.f32.mrf.mxu0 }
 0x112   : > { %1002 = vst.msk [vmem:[%s1641_s22 + $0x58] sm:$0xff] %vm272_vm3, %v970_v47  ;;  %v776_v53 = vadd.f32 %v775_v13, %v686_v52  ;;  %v851_v54 = vadd.f32 %v814_v50, %v333_v48 }
 0x113   : > { %v918_v55 = vld [vmem:[#allocation2 + $0xd8] sm:$0xff] }
 0x114   : > { %v836_v57 = vadd.f32 %v776_v53, %v318_v51  ;;  %v954_v59 = vadd.f32 %v1632_v62, %v918_v55  ;;  %884 = vst.msk [vmem:[#allocation2 + $0xe0] sm:$0xff] %vm272_vm3, %v851_v54 }
 0x115   : > { %v903_v60 = vld [vmem:[#allocation2 + $0x60] sm:$0xff] }
 0x116   : > { %v939_v61 = vadd.f32 %v1632_v62, %v903_v60  ;;  %869 = vst.msk [vmem:[#allocation2 + $0x68] sm:$0xff] %vm272_vm3, %v836_v57  ;;  %v986_v1 = vmax.f32 %v954_v59, 0.0 }
 0x117   : > { %v783_v0 = vpop.f32.mrf.mxu1  ;;  %v726_v6 = vpop.f32.mrf.mxu2 }
 0x118   : > { %v784_v2 = vadd.f32 %v783_v0, %v1627_v58  ;;  %v971_v3 = vmax.f32 %v939_v61, 0.0  ;;  %1018 = vst.msk [vmem:[%s1641_s22 + $0xd8] sm:$0xff] %vm272_vm3, %v986_v1  ;;  %v816_v8 = vadd.f32 %v815_v56, %v726_v6 }
 0x119   : > { %v689_v10 = vpop.f32.mrf.mxu0 }
 0x11a   : > { %v839_v7 = vadd.f32 %v784_v2, %v321_v63  ;;  %1003 = vst.msk [vmem:[%s1641_s22 + $0x60] sm:$0xff] %vm272_vm3, %v971_v3  ;;  %v779_v11 = vadd.f32 %v778_v29, %v689_v10  ;;  %v852_v12 = vadd.f32 %v816_v8, %v334_v4 }
 0x11b   : > { %v919_v13 = vld [vmem:[#allocation2 + $0xe0] sm:$0xff] }
 0x11c   : > { %872 = vst.msk [vmem:[#allocation2 + $0x80] sm:$0xff] %vm272_vm3, %v839_v7  ;;  %v837_v14 = vadd.f32 %v779_v11, %v319_v9  ;;  %v955_v58 = vadd.f32 %v1632_v62, %v919_v13 }
 0x11d   : > { %v904_v15 = vld [vmem:[#allocation2 + $0x68] sm:$0xff]  ;;  %885 = vst.msk [vmem:[#allocation2 + $0xe8] sm:$0xff] %vm272_vm3, %v852_v12 }
 0x11e   : > { %v940_v16 = vadd.f32 %v1632_v62, %v904_v15  ;;  %870 = vst.msk [vmem:[#allocation2 + $0x70] sm:$0xff] %vm272_vm3, %v837_v14  ;;  %v987_v20 = vmax.f32 %v955_v58, 0.0 }
 0x11f   : > { %v785_v19 = vpop.f32.mrf.mxu1  ;;  %v729_v24 = vpop.f32.mrf.mxu2 }
 0x120   : > { %v786_v21 = vadd.f32 %v785_v19, %v1643_v5  ;;  %v972_v22 = vmax.f32 %v940_v16, 0.0  ;;  %1019 = vst.msk [vmem:[%s1641_s22 + $0xe0] sm:$0xff] %vm272_vm3, %v987_v20  ;;  %v819_v26 = vadd.f32 %v818_v17, %v729_v24 }
 0x121   : > { %v691_v28 = vpop.f32.mrf.mxu0 }
 0x122   : > { %v840_v25 = vadd.f32 %v786_v21, %v322_v18  ;;  %1004 = vst.msk [vmem:[%s1641_s22 + $0x68] sm:$0xff] %vm272_vm3, %v972_v22  ;;  %v781_v30 = vadd.f32 %v780_v45, %v691_v28  ;;  %v853_v5 = vadd.f32 %v819_v26, %v335_v23 }
 0x123   : > { %v907_v29 = vld [vmem:[#allocation2 + $0x80] sm:$0xff] }
 0x124   : > { %v943_v31 = vadd.f32 %v1632_v62, %v907_v29  ;;  %873 = vst.msk [vmem:[#allocation2 + $0x88] sm:$0xff] %vm272_vm3, %v840_v25  ;;  %v920_v32 = vld [vmem:[#allocation2 + $0xe8] sm:$0xff]  ;;  %v838_v33 = vadd.f32 %v781_v30, %v320_v27 }
 0x125   : > { %v956_v35 = vadd.f32 %v1632_v62, %v920_v32  ;;  %v905_v36 = vld [vmem:[#allocation2 + $0x70] sm:$0xff]  ;;  %886 = vst.msk [vmem:[#allocation2 + $0xf0] sm:$0xff] %vm272_vm3, %v853_v5 }
 0x126   : > { %v975_v34 = vmax.f32 %v943_v31, 0.0  ;;  %v941_v37 = vadd.f32 %v1632_v62, %v905_v36  ;;  %871 = vst.msk [vmem:[#allocation2 + $0x78] sm:$0xff] %vm272_vm3, %v838_v33 }
 0x127   : > { %v988_v38 = vmax.f32 %v956_v35, 0.0  ;;  %v731_v42 = vpop.f32.mrf.mxu2 }
 0x128   : > { %1007 = vst.msk [vmem:[%s1641_s22 + $0x80] sm:$0xff] %vm272_vm3, %v975_v34  ;;  %v973_v39 = vmax.f32 %v941_v37, 0.0  ;;  %v821_v43 = vadd.f32 %v820_v40, %v731_v42 }
 0x129   : > { %1020 = vst.msk [vmem:[%s1641_s22 + $0xe8] sm:$0xff] %vm272_vm3, %v988_v38 }
 0x12a   : > { %1005 = vst.msk [vmem:[%s1641_s22 + $0x70] sm:$0xff] %vm272_vm3, %v973_v39  ;;  %v854_v46 = vadd.f32 %v821_v43, %v336_v41 }
 0x12b   : > { %v908_v44 = vld [vmem:[#allocation2 + $0x88] sm:$0xff] }
 0x12c   : > { %v944_v45 = vadd.f32 %v1632_v62, %v908_v44  ;;  %v921_v47 = vld [vmem:[#allocation2 + $0xf0] sm:$0xff]  ;;  %887 = vst.msk [vmem:[#allocation2 + $0xf8] sm:$0xff] %vm272_vm3, %v854_v46 }
 0x12d   : > { %v957_v49 = vadd.f32 %v1632_v62, %v921_v47  ;;  %v906_v50 = vld [vmem:[#allocation2 + $0x78] sm:$0xff] }
 0x12e   : > { %v976_v48 = vmax.f32 %v944_v45, 0.0  ;;  %v942_v51 = vadd.f32 %v1632_v62, %v906_v50 }
 0x12f   : > { %v989_v52 = vmax.f32 %v957_v49, 0.0 }
 0x130   : > { %1008 = vst.msk [vmem:[%s1641_s22 + $0x88] sm:$0xff] %vm272_vm3, %v976_v48  ;;  %v974_v53 = vmax.f32 %v942_v51, 0.0 }
 0x131   : > { %1021 = vst.msk [vmem:[%s1641_s22 + $0xf0] sm:$0xff] %vm272_vm3, %v989_v52 }
 0x132   : > { %1006 = vst.msk [vmem:[%s1641_s22 + $0x78] sm:$0xff] %vm272_vm3, %v974_v53 }
 0x133   : > { %v922_v54 = vld [vmem:[#allocation2 + $0xf8] sm:$0xff] }
 0x134   : > { %v958_v55 = vadd.f32 %v1632_v62, %v922_v54 }
 0x136   : > { %v990_v56 = vmax.f32 %v958_v55, 0.0 }
 0x138   : > { %1022 = vst.msk [vmem:[%s1641_s22 + $0xf8] sm:$0xff] %vm272_vm3, %v990_v56 }
 0x139 PF: > { %s13_s14 = sadd.s32 1, %s1432_s14   ;;  %s1785_s12 = smov %s1428_s13 }
 0x13a   : > { %p10_p5 = scmp.ge.s32.totalorder %s13_s14, 10   ;;  %s1786_s13 = smov %s1788_s15 }
 0x13c   :  { %12 = sbr.rel (!%p10_p5) target bundleno = 2 (0x2), region = 76 }

</bundles_post_ra>
